<compile_context>
chip_gen: v5e
topology: v5e:2x2
jax: 0.10.0
libtpu: 0.0.40
codegen_flags: <defaults>
</compile_context>

<pallas_src>
import functools

import numpy as np
import jax
import jax.numpy as jnp
from jax.experimental import pallas as pl
from jax.experimental.pallas import tpu as pltpu

RES_RATIO = 8
TEMP_SOFTMAX = 1000.0
INV_TEMP = 1.0 / TEMP_SOFTMAX


# ---------------------------------------------------------------------------
# Host-side helpers: PyTorch-compatible interpolation matrices (setup / glue)
# ---------------------------------------------------------------------------
def _bicubic_matrix_1d(in_size, out_size):
    """F.interpolate(mode='bicubic', align_corners=False), a = -0.75."""
    A = -0.75
    M = np.zeros((out_size, in_size), dtype=np.float64)
    scale = in_size / out_size

    def cc1(x):  # |x| <= 1
        return ((A + 2.0) * x - (A + 3.0)) * x * x + 1.0

    def cc2(x):  # 1 < |x| < 2
        return ((A * x - 5.0 * A) * x + 8.0 * A) * x - 4.0 * A

    for o in range(out_size):
        src = (o + 0.5) * scale - 0.5
        x0 = int(np.floor(src))
        t = src - x0
        ws = [cc2(t + 1.0), cc1(t), cc1(1.0 - t), cc2(2.0 - t)]
        for k in range(4):
            idx = min(max(x0 - 1 + k, 0), in_size - 1)
            M[o, idx] += ws[k]
    return M.astype(np.float32)


def _bilinear_matrix_1d(in_size, out_size, align_corners):
    """F.interpolate(mode='bilinear') 1-D weight matrix."""
    M = np.zeros((out_size, in_size), dtype=np.float64)
    for o in range(out_size):
        if align_corners:
            src = 0.0 if out_size == 1 else o * (in_size - 1) / (out_size - 1)
        else:
            src = max((o + 0.5) * (in_size / out_size) - 0.5, 0.0)
        i0 = min(int(np.floor(src)), in_size - 1)
        i1 = min(i0 + 1, in_size - 1)
        t = src - i0
        M[o, i0] += 1.0 - t
        M[o, i1] += t
    return M.astype(np.float32)


def _resize_bicubic_nchw(x, out_hw):
    H_in, W_in = x.shape[2], x.shape[3]
    Rh = jnp.asarray(_bicubic_matrix_1d(H_in, out_hw[0]))
    Rw = jnp.asarray(_bicubic_matrix_1d(W_in, out_hw[1]))
    return jnp.einsum('bchw,ph,qw->bcpq', x, Rh, Rw)


# ---------------------------------------------------------------------------
# TPU capability helpers (generation-aware tiling / dtypes)
# ---------------------------------------------------------------------------
def _device_kind():
    try:
        return jax.devices()[0].device_kind.lower()
    except Exception:
        return ""


def _tpu_vmem_capacity_bytes():
    try:
        return int(pltpu.get_tpu_info().vmem_capacity_bytes)
    except Exception:
        kind = _device_kind()
        if "v7" in kind or "7x" in kind:
            return 64 * 2 ** 20
        return 128 * 2 ** 20


def _exp_dtype_for_device():
    kind = _device_kind()
    if "v6" in kind or "v7" in kind or "7x" in kind:
        return jnp.bfloat16   # bf16 EUP: halves exp time + e footprint
    return jnp.float32        # v5e and older: no bf16 EUP


# ---------------------------------------------------------------------------
# Pallas kernel: masked-softmax attention, query-tiled, lane-dense partials
# ---------------------------------------------------------------------------
def _mask_attn_kernel(flags_ref, q_ref, k_ref, ind_ref, out_ref, *, exp_dtype):
    """One (batch, query-tile) grid step.

    flags_ref : [B, num_q] i32 SMEM (scalar-prefetched) "tile has selected queries"
    q_ref     : [1, tq, C]   bf16  query tokens (pooled-masked ref, pre-scaled 1/temp)
    k_ref     : [1, C, Na]   bf16  key tokens, channel-major (Na lane-dense)
    ind_ref   : [1, tq, 1]   f32   1.0 where the pooled guidance selects a query
    out_ref   : [1, 1, 1, Na] f32  per-(batch, tile) partial mask row (lane-dense)
    """
    flag = flags_ref[pl.program_id(0), pl.program_id(1)]

    @pl.when(flag == 0)
    def _skip():                      # fully-masked tile: exact zero contribution
        out_ref[...] = jnp.zeros_like(out_ref)

    @pl.when(flag != 0)
    def _compute():
        q = q_ref[0]                  # [tq, C] bf16
        k = k_ref[0]                  # [C, Na] bf16
        # NN contraction on the MXU, f32 accumulation: sim[i, j] = <q_i, k_j>/temp
        sim = jax.lax.dot_general(q, k, (((1,), (0,)), ((), ())),
                                  preferred_element_type=jnp.float32)   # [tq, Na]
        # Per-query softmax over keys (lane axis).  The normalizer folds into
        # the per-query weight w_i = ind_i / Z_i, so e/Z is never materialized.
        m = jnp.max(sim, axis=1, keepdims=True)                         # [tq, 1]
        e = jnp.exp((sim - m).astype(exp_dtype)).astype(jnp.float32)    # [tq, Na]
        z = jnp.sum(e, axis=1, keepdims=True)                           # [tq, 1]
        w = ind_ref[0] * pl.reciprocal(z, approx=True)                  # [tq, 1]
        # mask_j += sum_i w_i * e[i, j]: VPU multiply + sublane reduce -> a
        # lane-dense [1, Na] row.  No second MXU pass.
        contrib = jnp.sum(e * w, axis=0, keepdims=True)                 # [1, Na]
        out_ref[...] = contrib.astype(out_ref.dtype)[None, None]        # [1,1,1,Na]


def _pick_query_tile(num_queries, Na, C, vmem_cap, max_tq=None):
    """Largest query tile (multiple of 8) whose working set fits the VMEM budget."""
    q_pad8 = max(8, ((num_queries + 7) // 8) * 8)
    budget = int(vmem_cap * 0.5)
    fixed = 2 * Na * C * 2 + 2 * Na * 4 + (2 << 20)   # keys (2 bufs) + out + slack
    for cand in sorted({q_pad8, 2048, 1024, 512, 256, 128, 64, 32, 16, 8},
                       reverse=True):
        if cand > q_pad8 or (max_tq is not None and cand > max_tq):
            continue
        per_tile = 2 * (cand * C * 2 + cand * 4) + 4 * cand * Na * 4
        if fixed + per_tile <= budget:
            return cand
    return 8


def _masked_softmax_attention(q_tokens, k_tokens, ind_col, *, max_query_tile=None):
    """mask[b, j] = sum_i ind[b, i] * softmax_j(<q_i, k_j>)  ->  [B, Na] f32.

    q_tokens : [B, Nq, C] f32  query tokens (pooled-masked ref features * 1/temp)
    k_tokens : [B, C, Na] f32  key tokens (resized source features), channel-major
    ind_col  : [B, Nq, 1] f32  query-selection indicator
    """
    B, Nq, C = q_tokens.shape
    Na = k_tokens.shape[2]

    vmem_cap = _tpu_vmem_capacity_bytes()
    tq = _pick_query_tile(Nq, Na, C, vmem_cap, max_query_tile)
    num_q = -(-Nq // tq)
    Nq_pad = num_q * tq
    if Nq_pad != Nq:        # padded queries carry ind = 0 -> contribute exactly 0
        q_tokens = jnp.pad(q_tokens, ((0, 0), (0, Nq_pad - Nq), (0, 0)))
        ind_col = jnp.pad(ind_col, ((0, 0), (0, Nq_pad - Nq), (0, 0)))

    # Per-tile "has any selected query" flags (scalar-prefetched into SMEM).
    flags = (ind_col[..., 0].reshape(B, num_q, tq).sum(-1) > 0).astype(jnp.int32)

    q_bf = q_tokens.astype(jnp.bfloat16)
    k_bf = k_tokens.astype(jnp.bfloat16)

    # Resident key operand: single-buffer it when it is large relative to this
    # chip's VMEM (its block index is constant across the q axis).
    key_bytes = Na * C * 2
    single_buffer_keys = 2 * key_bytes > vmem_cap // 4
    key_map = lambda b, q, flags: (b, 0, 0)
    key_spec = pl.BlockSpec((1, C, Na), key_map)
    if single_buffer_keys:
        try:
            key_spec = pl.BlockSpec((1, C, Na), key_map,
                                    pipeline_mode=pl.Buffered(1))
        except TypeError:
            key_spec = pl.BlockSpec((1, C, Na), key_map)

    est = ((1 if single_buffer_keys else 2) * key_bytes
           + 2 * (tq * C * 2 + tq * 4)     # double-buffered query / ind tiles
           + 2 * Na * 4                    # double-buffered output rows
           + 4 * tq * Na * 4               # sim / e / e*w f32 intermediates
           + (2 << 20))
    vmem_limit = int(min(int(vmem_cap * 0.9), max(16 << 20, 2 * est)))

    partials = pl.pallas_call(
        functools.partial(_mask_attn_kernel, exp_dtype=_exp_dtype_for_device()),
        out_shape=jax.ShapeDtypeStruct((B, num_q, 1, Na), jnp.float32),
        grid_spec=pltpu.PrefetchScalarGridSpec(
            num_scalar_prefetch=1,
            grid=(B, num_q),
            in_specs=[
                pl.BlockSpec((1, tq, C), lambda b, q, flags: (b, q, 0)),  # queries
                key_spec,                                                  # keys
                pl.BlockSpec((1, tq, 1), lambda b, q, flags: (b, q, 0)),  # ind
            ],
            out_specs=pl.BlockSpec((1, 1, 1, Na),
                                   lambda b, q, flags: (b, q, 0, 0)),
        ),
        compiler_params=pltpu.CompilerParams(
            dimension_semantics=("parallel", "parallel"),
            vmem_limit_bytes=vmem_limit),
    )(flags, q_bf, k_bf, ind_col)

    return partials.sum(axis=(1, 2))       # [B, Na]


# ---------------------------------------------------------------------------
# Full forward (matches TrainingFreeAttentionBlocks.forward)
# ---------------------------------------------------------------------------
def training_free_attention_blocks_forward(feature_of_reference_image,
                                           ft_attn_of_source_image,
                                           guidance_on_reference_image,
                                           max_query_tile=None):
    features_cor = ft_attn_of_source_image['ft_cor']          # [B, C, Hf, Wf]
    features_matting = ft_attn_of_source_image['ft_matting']  # [B, C, Hf, Wf]
    attn_maps = list(ft_attn_of_source_image['attn'].values())[0]  # [B, H1, W1, N1]
    features_ref = feature_of_reference_image                 # [B, C, Hf, Wf]

    B, _, H, W = guidance_on_reference_image.shape
    h, w = H, W

    # binarize guidance
    guidance = jnp.where(guidance_on_reference_image > 0.5, 1.0, 0.0).astype(jnp.float32)

    # TODO(synk): guidance H/W must be divisible by res_ratio (reshape-based min-pool).
    H_attn, W_attn = H // RES_RATIO, W // RES_RATIO
    Na = H_attn * W_attn

    # bicubic resize of both feature maps to the attention resolution
    feat_rs = _resize_bicubic_nchw(features_cor, (H_attn, W_attn))   # [B, C, Ha, Wa]
    ref_rs = _resize_bicubic_nchw(features_ref, (H_attn, W_attn))    # [B, C, Ha, Wa]

    # min-pool (pool_type='min') of the binary guidance, kernel = stride = res_ratio
    pooled = guidance.reshape(B, 1, H_attn, RES_RATIO, W_attn, RES_RATIO).min(axis=(3, 5))
    ind_col = (pooled > 0).astype(jnp.float32).reshape(B, Na, 1)      # query selector

    C = feat_rs.shape[1]
    # 1/temp folded into the existing pooled-mask multiply (f32, before bf16 cast).
    q_tokens = (ref_rs * pooled * INV_TEMP).reshape(B, C, Na).transpose(0, 2, 1)  # [B, Na, C]
    k_tokens = feat_rs.reshape(B, C, Na)                                           # [B, C, Na]

    # ---- Pallas: attention softmax + masked token sum (bf16 MXU, f32 acc) ----
    mask_flat = _masked_softmax_attention(q_tokens, k_tokens, ind_col,
                                          max_query_tile=max_query_tile)   # [B, Na]

    # ---- tail chain, hoisted out of the kernel: separable 1-D bilinear
    #      resizes + batched matvec against the self-attention maps ----
    _, H1, W1, N1 = attn_maps.shape
    Ah = jnp.asarray(_bilinear_matrix_1d(H_attn, H1, align_corners=True))   # [H1, Ha]
    Aw = jnp.asarray(_bilinear_matrix_1d(W_attn, W1, align_corners=True))   # [W1, Wa]
    Bh = jnp.asarray(_bilinear_matrix_1d(H1, h, align_corners=False))       # [h, H1]
    Bw = jnp.asarray(_bilinear_matrix_1d(W1, w, align_corners=False))       # [w, W1]

    mask2d = mask_flat.reshape(B, H_attn, W_attn)
    x1 = jnp.einsum('ph,bhw,qw->bpq', Ah, mask2d, Aw)                 # [B, H1, W1]
    attn_flat = attn_maps.reshape(B, N1, N1)                          # A[b, j, i]
    y = jnp.einsum('bi,bji->bj', x1.reshape(B, N1), attn_flat)        # [B, N1]
    trimap = jnp.einsum('hp,bpq,wq->bhw', Bh, y.reshape(B, H1, W1), Bw)  # [B, h, w]

    return {
        'trimap': trimap.reshape(B, 1, h, w),
        'feature': features_matting,
        'mask': mask_flat.reshape(B, 1, H_attn, W_attn),
    }


# ---------------------------------------------------------------------------
# Pure-JAX reference: f32 full softmax + dense kron'd resize matrices
# ---------------------------------------------------------------------------
def _reference_forward(features_ref_img, ft_attn, guidance_img):
    features_cor = ft_attn['ft_cor']
    attn_maps = list(ft_attn['attn'].values())[0]
    B, _, H, W = guidance_img.shape
    h, w = H, W
    guidance = jnp.where(guidance_img > 0.5, 1.0, 0.0).astype(jnp.float32)
    H_attn, W_attn = H // RES_RATIO, W // RES_RATIO
    Na = H_attn * W_attn

    feat_rs = _resize_bicubic_nchw(features_cor, (H_attn, W_attn))
    ref_rs = _resize_bicubic_nchw(features_ref_img, (H_attn, W_attn))
    pooled = guidance.reshape(B, 1, H_attn, RES_RATIO, W_attn, RES_RATIO).min(axis=(3, 5))
    ind = (pooled > 0).astype(jnp.float32).reshape(B, Na)
    C = feat_rs.shape[1]
    ref_tokens = (ref_rs * pooled).reshape(B, C, Na).transpose(0, 2, 1)
    feat_tokens = feat_rs.reshape(B, C, Na).transpose(0, 2, 1)

    sim = jnp.einsum('bic,bjc->bij', ref_tokens, feat_tokens) / TEMP_SOFTMAX
    sm = jax.nn.softmax(sim, axis=-1)
    mask = jnp.einsum('bi,bij->bj', ind, sm)                         # [B, Na]

    _, H1, W1, N1 = attn_maps.shape
    Ah = _bilinear_matrix_1d(H_attn, H1, align_corners=True)
    Aw = _bilinear_matrix_1d(W_attn, W1, align_corners=True)
    Bh = _bilinear_matrix_1d(H1, h, align_corners=False)
    Bw = _bilinear_matrix_1d(W1, w, align_corners=False)
    vinT = jnp.asarray(np.kron(Ah, Aw).T)                            # [Na, N1]
    uT = jnp.asarray(np.kron(Bh, Bw).T)                              # [N1, h*w]

    x1 = mask @ vinT                                                 # [B, N1]
    y = jnp.einsum('bi,bji->bj', x1, attn_maps.reshape(B, N1, N1))   # [B, N1]
    trimap = y @ uT                                                  # [B, h*w]
    return mask, trimap


if __name__ == "__main__":
    key = jax.random.PRNGKey(0)
    k1, k2, k3, k4, k5 = jax.random.split(key, 5)

    B, C = 2, 32
    Hf = Wf = 16            # feature spatial size
    Hg = Wg = 64            # guidance spatial size -> H_attn = W_attn = 8, Na = 64
    H1 = W1 = 8             # self-attention map resolution, N1 = 64

    feature_of_reference_image = jax.random.normal(k1, (B, C, Hf, Wf), jnp.float32)
    ft_cor = jax.random.normal(k2, (B, C, Hf, Wf), jnp.float32)
    ft_matting = jax.random.normal(k3, (B, C, Hf, Wf), jnp.float32)

    attn_raw = jax.random.uniform(k4, (B, H1, W1, H1 * W1), jnp.float32) + 0.1
    attn = attn_raw / attn_raw.sum(-1, keepdims=True)      # rows are distributions

    guidance = jax.random.uniform(k5, (B, 1, Hg, Wg), jnp.float32) * 0.4
    guidance = guidance.at[:, :, 16:48, 16:48].set(0.9)    # solid ROI so min-pool keeps tokens

    ft_attn_of_source_image = {'ft_cor': ft_cor, 'attn': {'24': attn},
                               'ft_matting': ft_matting}

    mask_ref, trimap_ref = _reference_forward(
        feature_of_reference_image, ft_attn_of_source_image, guidance)

    # Run twice: (a) forced small query tile -> multi-tile path with fully-masked
    # tiles skipped via the prefetched flags, (b) default auto-sized single tile.
    for max_tq in (16, None):
        out = training_free_attention_blocks_forward(
            feature_of_reference_image, ft_attn_of_source_image, guidance,
            max_query_tile=max_tq)
        out = jax.block_until_ready(out)

        np.testing.assert_allclose(np.asarray(out['mask']).reshape(B, -1),
                                   np.asarray(mask_ref), rtol=1e-2, atol=2e-3)
        np.testing.assert_allclose(np.asarray(out['trimap']).reshape(B, -1),
                                   np.asarray(trimap_ref), rtol=1e-2, atol=2e-3)
        assert out['trimap'].shape == (B, 1, Hg, Wg)
        assert out['mask'].shape == (B, 1, Hg // RES_RATIO, Wg // RES_RATIO)
        assert out['feature'].shape == (B, C, Hf, Wf)

    print("KERNEL_OK")
</pallas_src>

<mosaic_0001>
module attributes {stable_mosaic.version = 11 : i64} {
  func.func @_mask_attn_kernel(%arg0: i32, %arg1: i32, %arg2: memref<2x4xi32, #tpu.memory_space<smem>>, %arg3: memref<1x16x32xbf16, #tpu.memory_space<vmem>>, %arg4: memref<1x32x64xbf16, #tpu.memory_space<vmem>>, %arg5: memref<1x16x1xf32, #tpu.memory_space<vmem>>, %arg6: memref<1x1x1x64xf32, #tpu.memory_space<vmem>>) attributes {dimension_semantics = [#tpu.dimension_semantics<parallel>, #tpu.dimension_semantics<parallel>], iteration_bounds = array<i64: 2, 4>, scalar_prefetch = 1 : i64, scratch_operands = 0 : i64, tpu.core_type = #tpu.core_type<tc>, window_params = [{transform_indices = @transform_0, window_bounds = array<i64: 1, 16, 32>}, {transform_indices = @transform_1, window_bounds = array<i64: 1, 32, 64>}, {transform_indices = @transform_2, window_bounds = array<i64: 1, 16, 1>}, {transform_indices = @transform_3, window_bounds = array<i64: 1, 1, 1, 64>}]} {
    %0 = arith.index_cast %arg0 : i32 to index
    %1 = arith.index_cast %arg1 : i32 to index
    %2 = memref.load %arg2[%0, %1] : memref<2x4xi32, #tpu.memory_space<smem>>
    %c0_i32 = arith.constant 0 : i32
    %3 = arith.cmpi eq, %2, %c0_i32 : i32
    %4 = arith.extui %3 : i1 to i32
    %c0_i32_0 = arith.constant 0 : i32
    %5 = arith.cmpi ne, %4, %c0_i32_0 : i32
    scf.if %5 {
      %cst = arith.constant 0.000000e+00 : f32
      %9 = vector.broadcast %cst : f32 to vector<1x1x1x64xf32>
      %c0 = arith.constant 0 : index
      %c0_3 = arith.constant 0 : index
      %c0_4 = arith.constant 0 : index
      %c0_5 = arith.constant 0 : index
      %10 = vector.load %arg6[%c0, %c0_3, %c0_4, %c0_5] : memref<1x1x1x64xf32, #tpu.memory_space<vmem>>, vector<1x1x1x64xf32>
      tpu.vector_store %arg6[%c0, %c0_3, %c0_4, %c0_5], %9 {strides = array<i32>} : memref<1x1x1x64xf32, #tpu.memory_space<vmem>>, vector<1x1x1x64xf32>,
    } else {
    }
    %c0_i32_1 = arith.constant 0 : i32
    %6 = arith.cmpi ne, %2, %c0_i32_1 : i32
    %7 = arith.extui %6 : i1 to i32
    %c0_i32_2 = arith.constant 0 : i32
    %8 = arith.cmpi ne, %7, %c0_i32_2 : i32
    scf.if %8 {
      %c0 = arith.constant 0 : index
      %c0_3 = arith.constant 0 : index
      %c0_4 = arith.constant 0 : index
      %9 = vector.load %arg3[%c0, %c0_3, %c0_4] : memref<1x16x32xbf16, #tpu.memory_space<vmem>>, vector<1x16x32xbf16>
      %10 = vector.shape_cast %9 : vector<1x16x32xbf16> to vector<16x32xbf16>
      %c0_5 = arith.constant 0 : index
      %c0_6 = arith.constant 0 : index
      %c0_7 = arith.constant 0 : index
      %11 = vector.load %arg4[%c0_5, %c0_6, %c0_7] : memref<1x32x64xbf16, #tpu.memory_space<vmem>>, vector<1x32x64xbf16>
      %12 = vector.shape_cast %11 : vector<1x32x64xbf16> to vector<32x64xbf16>
      %cst = arith.constant dense<0.000000e+00> : vector<16x64xf32>
      %13 = tpu.matmul %10, %12, %cst {dimension_numbers = #tpu.dot_dimension_numbers<[1], [0], [0], [1], [0, 0, 1, 1], [], []>} : vector<16x32xbf16>, vector<32x64xbf16>, vector<16x64xf32> -> vector<16x64xf32>
      %cst_8 = arith.constant dense<0xFF800000> : vector<16xf32>
      %14 = vector.multi_reduction <maximumf>, %13, %cst_8 [1] : vector<16x64xf32> to vector<16xf32>
      %15 = vector.shape_cast %14 : vector<16xf32> to vector<16x1xf32>
      %16 = vector.broadcast %15 : vector<16x1xf32> to vector<16x64xf32>
      %17 = arith.subf %13, %16 : vector<16x64xf32>
      %18 = math.exp %17 : vector<16x64xf32>
      %cst_9 = arith.constant dense<0.000000e+00> : vector<16xf32>
      %19 = vector.multi_reduction <add>, %18, %cst_9 [1] : vector<16x64xf32> to vector<16xf32>
      %20 = vector.shape_cast %19 : vector<16xf32> to vector<16x1xf32>
      %c0_10 = arith.constant 0 : index
      %c0_11 = arith.constant 0 : index
      %c0_12 = arith.constant 0 : index
      %21 = vector.load %arg5[%c0_10, %c0_11, %c0_12] : memref<1x16x1xf32, #tpu.memory_space<vmem>>, vector<1x16x1xf32>
      %22 = vector.shape_cast %21 : vector<1x16x1xf32> to vector<16x1xf32>
      %23 = tpu.reciprocal %20 {approx = true} : vector<16x1xf32> -> vector<16x1xf32>
      %24 = arith.mulf %22, %23 : vector<16x1xf32>
      %25 = vector.broadcast %24 : vector<16x1xf32> to vector<16x64xf32>
      %26 = arith.mulf %18, %25 : vector<16x64xf32>
      %cst_13 = arith.constant dense<0.000000e+00> : vector<64xf32>
      %27 = vector.multi_reduction <add>, %26, %cst_13 [0] : vector<16x64xf32> to vector<64xf32>
      %28 = vector.shape_cast %27 : vector<64xf32> to vector<1x64xf32>
      %29 = vector.shape_cast %28 : vector<1x64xf32> to vector<1x1x1x64xf32>
      %c0_14 = arith.constant 0 : index
      %c0_15 = arith.constant 0 : index
      %c0_16 = arith.constant 0 : index
      %c0_17 = arith.constant 0 : index
      %30 = vector.load %arg6[%c0_14, %c0_15, %c0_16, %c0_17] : memref<1x1x1x64xf32, #tpu.memory_space<vmem>>, vector<1x1x1x64xf32>
      tpu.vector_store %arg6[%c0_14, %c0_15, %c0_16, %c0_17], %29 {strides = array<i32>} : memref<1x1x1x64xf32, #tpu.memory_space<vmem>>, vector<1x1x1x64xf32>,
    } else {
    }
    return
  }
  func.func @transform_0(%arg0: i32, %arg1: i32, %arg2: memref<2x4xi32, #tpu.memory_space<smem>>) -> (i32, i32, i32) {
    %c0_i32 = arith.constant 0 : i32
    %c0_i32_0 = arith.constant 0 : i32
    return %arg0, %arg1, %c0_i32 : i32, i32, i32
  }
  func.func @transform_1(%arg0: i32, %arg1: i32, %arg2: memref<2x4xi32, #tpu.memory_space<smem>>) -> (i32, i32, i32) {
    %c0_i32 = arith.constant 0 : i32
    %c0_i32_0 = arith.constant 0 : i32
    %c0_i32_1 = arith.constant 0 : i32
    return %arg0, %c0_i32, %c0_i32_0 : i32, i32, i32
  }
  func.func @transform_2(%arg0: i32, %arg1: i32, %arg2: memref<2x4xi32, #tpu.memory_space<smem>>) -> (i32, i32, i32) {
    %c0_i32 = arith.constant 0 : i32
    %c0_i32_0 = arith.constant 0 : i32
    return %arg0, %arg1, %c0_i32 : i32, i32, i32
  }
  func.func @transform_3(%arg0: i32, %arg1: i32, %arg2: memref<2x4xi32, #tpu.memory_space<smem>>) -> (i32, i32, i32, i32) {
    %c0_i32 = arith.constant 0 : i32
    %c0_i32_0 = arith.constant 0 : i32
    %c0_i32_1 = arith.constant 0 : i32
    return %arg0, %arg1, %c0_i32, %c0_i32_0 : i32, i32, i32, i32
  }
}

</mosaic_0001>

<bundles_post_ra>
// kernel: tpu_custom_call.1
= control target key start
LH: loop header
LB: loop body
LE: loop exit
PB: predicated region body
PF: predicated region fallthrough
CT: control target
= control target key end

     0   :  { %s720_s18 = smov [#allocation3]   ;;  %s900_s0 = inlined_call_operand.vmem [shape: s32[2,4], index: 0, kind: input, shape index: {}]   ;;  %s901_s1 = inlined_call_operand.vmem [shape: bf16[2,64,32], index: 1, kind: input, shape index: {}]   ;;  %s902_s2 = inlined_call_operand.vmem [shape: bf16[2,32,64], index: 2, kind: input, shape index: {}]   ;;  %s903_s3 = inlined_call_operand.vmem [shape: f32[2,64,1], index: 3, kind: input, shape index: {}]   ;;  %s904_s4 = inlined_call_operand.hbm [shape: f32[2,4,1,64], index: 4, kind: output, shape index: {}]  }
   0x1   :  { %s10_s17 = sshll.u32 %s900_s0, 4  ;;  %s11_s17 = int_to_ptr.vmem [resolvable:$true] %s10_s17 }
   0x2   :  { %13 = dma.vmem_to_smem %s11_s17, 32, %s720_s18, [#allocation2] }
   0x3   :  { %682 = dma.done.wait [#allocation2], 32 }
   0x4   :  { %683 = vsyncadd [#allocation2], 4294967264 }
   0x5   :  { %16 = sfence }
   0x6   :  { %17 = vsyncpa [#allocation5], 0 }
   0x7   :  { %19 = vsyncpa [#allocation5 + $0x1], 0  ;;  %s751_s19 = smov 0   ;;  %s753_s20 = smov 0  }
   0x8   :  { %s755_s21 = smov 0   ;;  %s757_s22 = smov 0  }
   0x9   :  { %s759_s23 = smov 0   ;;  %s761_s24 = smov 0  }
   0xa   :  { %s763_s0 = smov 0   ;;  %s765_s25 = smov 0  }
   0xb LB: > { %911 = sst [smem:[#allocation8_spill]] %s698_s21  ;;  %s490_s26 = sadd.s32 4294967295, %s718_s25   ;;  %s718_s25 = sphi %s765_s25, %s25_s25   ;;  %s714_s0 = sphi %s763_s0, %s928_s0   ;;  %s710_s24 = sphi %s761_s24, %s927_s24   ;;  %s706_s23 = sphi %s759_s23, %s926_s23   ;;  %s702_s22 = sphi %s757_s22, %s925_s22   ;;  %s698_s21 = sphi %s755_s21, %s924_s21   ;;  %s694_s20 = sphi %s753_s20, %s930_s20   ;;  %s690_s19 = sphi %s751_s19, %s929_s19  }
   0xc   : > { %912 = sst [smem:[#allocation9_spill]] %s710_s24  ;;  %s491_s27 = sadd.s32 4294967294, %s718_s25  }
   0xd   : > { %913 = sst [smem:[#allocation10_spill]] %s714_s0  ;;  %s34_s28 = sadd.s32 1, %s710_s24 }
   0xe   : > { %p35_p0 = scmp.ge.s32.totalorder %s34_s28, 4  ;;  %s37_s29 = sadd.s32 1, %s714_s0 }
   0xf   : > { %p138_p1 = scmp.ne.s32.totalorder %s698_s21, %s694_s20  ;;  %p139_p2 = scmp.eq.s32.totalorder %s490_s26, 7 }
  0x10   : > { %s932_s28 = smov (%p35_p0, %s34_s28), 0  ;;  %s934_s29 = smov (!%p35_p0, %s37_s29), %s714_s0 }
  0x11   : > { %914 = sst [smem:[#allocation11_spill]] %s932_s28  ;;  %s124_s30 = ssub.s32 %s710_s24, %s932_s28 }
  0x12   : > { %p802_p3 = por %p139_p2, %p138_p1  ;;  %p39_p4 = scmp.ge.s32.totalorder %s934_s29, 2 }
  0x13   : > { %p144_p5 = scmp.ne.s32.totalorder %s694_s20, %s690_s19  ;;  %p145_p6 = scmp.eq.s32.totalorder %s491_s27, 7 }
  0x14   : > { %p494_p7 = scmp.ge.s32.totalorder %s718_s25, 1  ;;  %s936_s29 = smov (%p39_p4, %s934_s29), 0 }
  0x15   : > { %916 = sst [smem:[#allocation12_spill]] %s936_s29  ;;  %p811_p8 = por %p145_p6, %p144_p5 }
  0x16   : > { %p197_p9 = scmp.lt.s32.totalorder %s718_s25, 9  ;;  %s123_s7 = ssub.s32 %s714_s0, %s936_s29 }
  0x17   : > { %s917_s6 = scalar_select %p811_p8, 1, 0 }
  0x18   : > { %s128_s8 = sadd.s32 1, %s698_s21  ;;  %s125_s9 = sor.u32 %s124_s30, %s123_s7 }
  0x19   : > { %918 = sst [smem:[#allocation13_spill]] %s917_s6  ;;  %p198_p10 = pnand %p494_p7, %p197_p9 }
  0x1a   : > { %p126_p11 = scmp.eq.s32.totalorder %s125_s9, 0  ;;  %s495_s12 = sshll.u32 (!%p198_p10), %s702_s22, 1 }
  0x1b   : > { %201 = sbr.rel (%p198_p10) target bundleno = 582 (0x246), region = 32  ;;  %p239_p12 = scmp.lt.s32.totalorder (!%p198_p10), %s706_s23, 1 }
  0x1c   : > { %s820_s10 = scalar_select %p126_p11, %s698_s21, %s128_s8  }
  0x1d   : > { %p241_p13 = scmp.lt.s32.totalorder (!%p198_p10), %s495_s12, 7  ;;  %s264_s13 = sshra.s32 (!%p198_p10), %s702_s22, 7 }
  0x1e   : > { %919 = sst [smem:[#allocation14_spill]] %s820_s10  ;;  %s266_s24 = sadd.s32 (!%p198_p10), %s706_s23, %s264_s13 }
  0x1f   : > { %s269_s10 = sand.u32 (!%p198_p10), 127, %s702_s22  ;;  %s503_s21 = sshll.u32 (!%p198_p10), %s266_s24, 7 }
  0x20   : > { %s240_s14 = scalar_select %p239_p12, %s706_s23, 1 }
  0x21   : > { %s938_s12 = smov (!%p241_p13, %s495_s12), 7 }
  0x22   : > { %s496_s15 = sshll.u32 %s240_s14, 3  ;;  %s522_s16 = sshll.u32 %s240_s14, 4 }
  0x23   : > { %s244_s17 = sadd.s32 %s496_s15, %s938_s12  ;;  %s252_s27 = scalar_lea.vmem %s902_s2, %s522_s16 }
  0x24   : > { %s497_s30 = sshll.u32 %s244_s17, 2  ;;  %s502_s7 = sshll.u32 %s244_s17, 3 }
  0x25   : > { %s246_s11 = scalar_lea.vmem %s901_s1, %s497_s30  ;;  %s836_s0 = scalar_lea.vmem %s903_s3, %s502_s7 }
  0x26   : > { %s270_s14 = sadd.s32 %s503_s21, %s269_s10  ;;  %s920_s15 = sand.u32 1, %s694_s20  }
  0x27   : > { %s271_s12 = sld [smem:[#allocation3 + %s270_s14]]  ;;  %s842_s6 = scalar_lea.vmem [#allocation4], %s920_s15 }
  0x2d   : > { %p504_p0 = scmp.ne.s32.totalorder %s271_s12, 0 }
  0x2f   : > { %275 = sbr.rel (%p504_p0) target bundleno = 54 (0x36), region = 36 }
  0x34   : > { %vm276_vm0 = vcmask 516096   ;;  %v721_v0 = vmov 0.0  }
  0x35   : > { %277 = vst.msk [vmem:[%s842_s6] sm:$0x1] %vm276_vm0, %v721_v0 }
  0x36 PF: > { %p505_p1 = scmp.eq.s32.totalorder %s271_s12, 0 }
  0x38   : > { %281 = sbr.rel (%p505_p1) target bundleno = 566 (0x236), region = 40 }
  0x3d   : > { %v525_v1 = vld [vmem:[%s252_s27 + $0x8] sm:$0xff]  ;;  %v524_v2 = vld [vmem:[%s252_s27] sm:$0xff]  ;;  %vm305_vm1 = vcmask 261120   ;;  %vm323_vm2 = vcmask 523264   ;;  %v722_v18 = vmov 0   ;;  %vm369_vm3 = vcmask 516096  }
  0x3e   : > { %315 = vmatpush.bf16.msra.mxu0 %v525_v1  ;;  %v523_v3 = vld [vmem:[%s246_s11] sm:$0xff]  ;;  %600 = vset.pattern.permute.xlu2 %v722_v18  ;;  %v343_v24 = vld [vmem:[%s836_s0 + $0x8] sm:$0xff] }
  0x3f   : > { %601 = vset.pattern.permute.xlu0 %v722_v18  ;;  %v342_v20 = vld [vmem:[%s836_s0] sm:$0xff] }
  0x42   : > { %316 = vmatpush.bf16.msra.mxu0 %v524_v2 }
  0x45   : > { %518 = vmatmul.msk.bf16.vlgmr.msra.gmra.mxu0 %vm305_vm1, %v523_v3 }
  0xc2   : > { %v318_v4 = vpop.f32.mrf.mxu0 }
  0xc3   : > { %v324_v5 = vsel %vm323_vm2, %v318_v4, -inf }
  0xc4   : > { %325 = vmax.xlane.f32.xlu0 %v324_v5 }
  0xca   : > { %v320_v6 = vpop.f32.mrf.mxu0 }
  0xcb   : > { %v327_v7 = vsel %vm323_vm2, %v320_v6, -inf }
  0xcc   : > { %328 = vmax.xlane.f32.xlu0 %v327_v7 }
 0x137   : > { %v326_v8 = vpop.xlane.xlu0 %325 }
 0x138   : > { %v330_v9 = vsub.f32 %v318_v4, %v326_v8 }
 0x13a   : > { %v332_v10 = vmul.f32 1.442695, %v330_v9 }
 0x13c   : > { %602 = vpow2.f32 %v332_v10 }
 0x13f   : > { %v329_v11 = vpop.xlane.xlu0 %328 }
 0x140   : > { %v331_v12 = vsub.f32 %v320_v6, %v329_v11 }
 0x142   : > { %v603_v13 = vpop.eup %602  ;;  %v334_v14 = vmul.f32 1.442695, %v331_v12 }
 0x143   : > { %v336_v15 = vsel %vm323_vm2, %v603_v13, 0.0 }
 0x144   : > { %604 = vpow2.f32 %v334_v14  ;;  %337 = vadd.xlane.f32.xlu1 %v336_v15 }
 0x14a   : > { %v605_v16 = vpop.eup %604 }
 0x14b   : > { %v339_v17 = vsel %vm323_vm2, %v605_v16, 0.0 }
 0x14c   : > { %340 = vadd.xlane.f32.xlu1 %v339_v17 }
 0x1b7   : > { %v338_v19 = vpop.xlane.xlu1 %337 }
 0x1b8   : > { %606 = vrcp.f32 %v338_v19 }
 0x1be   : > { %v607_v21 = vpop.eup %606 }
 0x1bf   : > { %v341_v22 = vpop.xlane.xlu1 %340  ;;  %v346_v23 = vmul.f32 %v607_v21, %v342_v20 }
 0x1c0   : > { %608 = vrcp.f32 %v341_v22 }
 0x1c1   : > { %350 = vperm.xlu2 %600, %v346_v23  }
 0x1c6   : > { %v609_v25 = vpop.eup %608 }
 0x1c7   : > { %v347_v26 = vmul.f32 %v609_v25, %v343_v24 }
 0x1c9   : > { %355 = vperm.xlu2 %600, %v347_v26  }
 0x21b   : > { %v351_v27 = vpop.permute.xlu2 %350 }
 0x21c   : > { %v358_v28 = vmul.f32 %v603_v13, %v351_v27 }
 0x21e   : > { %v360_v31 = vsel %vm323_vm2, %v358_v28, 0.0 }
 0x223   : > { %v356_v29 = vpop.permute.xlu2 %355 }
 0x224   : > { %v359_v30 = vmul.f32 %v605_v16, %v356_v29 }
 0x226   : > { %v361_v32 = vsel %vm323_vm2, %v359_v30, 0.0 }
 0x227   : > { %v362_v33 = vadd.f32 %v361_v32, %v360_v31 }
 0x229   : > { %v363_v34 = vrot.slane %v362_v33, 4 }
 0x22b   : > { %v364_v35 = vadd.f32 %v363_v34, %v362_v33 }
 0x22d   : > { %v365_v36 = vrot.slane %v364_v35, 2 }
 0x22f   : > { %v366_v37 = vadd.f32 %v365_v36, %v364_v35 }
 0x231   : > { %v367_v38 = vrot.slane %v366_v37, 1 }
 0x233   : > { %v368_v39 = vadd.f32 %v367_v38, %v366_v37 }
 0x235   : > { %370 = vst.msk [vmem:[%s842_s6] sm:$0x1] %vm369_vm3, %v368_v39 }
 0x236 PF: > { %s519_s21 = sshll.u32 %s706_s23, 2  ;;  %s384_s0 = sshll.u32 %s842_s6, 4  ;;  %s385_s0 = int_to_ptr.vmem [resolvable:$true] %s384_s0 }
 0x237   : > { %s381_s24 = sadd.s32 %s702_s22, %s519_s21  ;;  %s921_s13 = sand.u32 1, %s694_s20  }
 0x238   : > { %s382_s10 = scalar_lea.hbm %s904_s4, %s381_s24  ;;  %s372_s16 = scalar_lea.sflag [#allocation5], %s921_s13 }
 0x239   : > { %s386_s11 = sshll.u32 %s382_s10, 4  ;;  %s642_s22 = scalar_lea.hbm %s904_s4, 8  ;;  %s387_s11 = int_to_ptr.hbm [resolvable:$true] %s386_s11 }
 0x23a   : > { %s636_s17 = sshra.s32 %s387_s11, 4  ;;  %s637_s17 = int_to_ptr.hbm [resolvable:$true] %s636_s17 }
 0x23b   : > { %s638_s18 = scalar_lea.hbm %s637_s17, 1  ;;  %p643_p6 = scmp.lt.s32.totalorder %s637_s17, %s904_s4 }
 0x23c   : > { %p639_p2 = scmp.ne.s32.totalorder %s637_s17, %s638_s18  ;;  %p644_p7 = scmp.lt.s32.totalorder %s642_s22, %s638_s18 }
 0x23e   : > { %p640_p4 = pnand %p639_p2, %p802_p3  ;;  %p645_p9 = por %p644_p7, %p643_p6 }
 0x240   : > { %p641_p5 = pneg %p640_p4 }
 0x242   : > { %p646_p10 = pnand %p645_p9, %p641_p5 }
 0x244   : > { %649 = shalt.err (!%p646_p10)
}
 0x245   : > { %526 = dma.vmem_to_hbm [thread:$0]  (%p802_p3), %s385_s0, 16, %s387_s11, %s372_s16  }
 0x246 PF: > { %p532_p11 = scmp.ge.s32.totalorder %s718_s25, 2  ;;  %s398_s7 = sand.u32 1, %s690_s19  }
 0x247   : > { %s399_s8 = scalar_lea.sflag [#allocation5], %s398_s7 }
 0x248   : > { %p529_p12 = pnand %p532_p11, %p811_p8 }
 0x24a   : > { %p530_p13 = pneg %p529_p12 }
 0x24c   : > { %685 = dma.done.wait (%p530_p13), %s399_s8, 16  }
 0x24d   : > { %687 = vsyncadd (%p530_p13), %s399_s8, 4294967280  ;;  %s25_s25 = sadd.s32 1, %s718_s25   ;;  %s923_s9 = sld [smem:[#allocation8_spill]] }
 0x24e   : > { %p22_p0 = scmp.ge.s32.totalorder %s25_s25, 10   ;;  %s924_s21 = sld [smem:[#allocation14_spill]] }
 0x24f   : > { %s925_s22 = sld [smem:[#allocation9_spill]]  ;;  %s929_s19 = smov %s694_s20 }
 0x250   : > { %s926_s23 = sld [smem:[#allocation10_spill]]  ;;  %24 = sbr.rel (!%p22_p0) target bundleno = 11 (0xb), region = 81 }
 0x251   : > { %s927_s24 = sld [smem:[#allocation11_spill]] }
 0x252   : > { %s928_s0 = sld [smem:[#allocation12_spill]] }
 0x253   : > { %s930_s20 = smov %s923_s9 }
 0x255   :  { %404 = vsyncpa [#allocation5], 1 }
 0x256   :  { %406 = vsyncpa [#allocation5 + $0x1], 1 }

</bundles_post_ra>
